<compile_context>
chip_gen: v5e
topology: v5e:2x2
jax: 0.10.0
libtpu: 0.0.40
codegen_flags: <defaults>
</compile_context>

<pallas_src>
import functools

import jax
import jax.numpy as jnp
from jax.experimental import pallas as pl
from jax.experimental.pallas import tpu as pltpu

KSIZE = 3  # ConcatConv2d default kernel size


def _concat_conv2d_kernel(x_ref, w_ref, b_ref, o_ref, *, ksize_h, ksize_w, in_w):
    """Valid, stride-1 2-D conv for a block of B samples, as 9 per-tap matmuls.

    x_ref: (B, Cin, H*W + pad)   flattened, per-sample zero-padded input
    w_ref: (KH*KW, Cout, Cin)    per-tap weight matrices (t channel removed)
    b_ref: (1, Cout, 1)          effective bias (t channel folded in)
    o_ref: (B, Cout, H*W)        "same-size" flat output; the valid result is
                                 the top-left Hout x Wout of each H x W plane.
    """
    b_blk, c_out, hw = o_ref.shape
    _, _, c_in = w_ref.shape

    x = x_ref[...]          # whole block, loaded once
    w_all = w_ref[...]      # (KH*KW, Cout, Cin), ~1.4 KB -> a few vregs
    bias = b_ref[...]       # (1, Cout, 1)

    acc = jnp.zeros((b_blk, c_out, hw), jnp.float32)
    for kh in range(ksize_h):
        for kw in range(ksize_w):
            # Output flat index j = ho*W + wo needs input flat index j + shift.
            shift = kh * in_w + kw
            zs = x[:, :, shift:shift + hw]                       # (B, Cin, H*W)
            wk = jnp.broadcast_to(w_all[kh * ksize_w + kw],
                                  (b_blk, c_out, c_in))          # (B, Cout, Cin)
            # Batched (Cout, Cin) @ (Cin, H*W) on the MXU, lane-dense N dim.
            acc = acc + jnp.einsum("boc,bcj->boj", wk, zs,
                                   preferred_element_type=jnp.float32)
    o_ref[...] = (acc + bias).astype(o_ref.dtype)


def _pick_batch_block(n):
    # Batch several samples per grid step, but keep >= 2 "parallel" blocks
    # whenever possible (v7x has 2 TensorCores; grid=(1,) leaves one idle).
    for cand in (8, 4, 2, 1):
        if n % cand == 0 and n // cand >= 2:
            return cand
    return n


def concat_conv2d(t, x, weight, bias):
    """ConcatConv2d forward.

    t      : scalar (float)
    x      : (N, Cin, H, W)          NCHW, like the PyTorch module input
    weight : (Cout, Cin+1, KH, KW)   PyTorch OIHW layout
    bias   : (Cout,)
    returns: (N, Cout, H-KH+1, W-KW+1)  NCHW (padding=0, stride=1)
    """
    n, c_in, h, w = x.shape
    c_out, c_in1, ksz_h, ksz_w = weight.shape
    assert c_in1 == c_in + 1
    h_out, w_out = h - ksz_h + 1, w - ksz_w + 1
    hw = h * w
    pad = (ksz_h - 1) * w + (ksz_w - 1)
    sp = hw + pad

    # --- fold the constant-t channel into the bias (pure algebra) ---
    eff_bias = bias + t * jnp.sum(weight[:, 0, :, :], axis=(-1, -2))      # (Cout,)
    eff_bias = eff_bias.reshape(1, c_out, 1).astype(jnp.float32)

    # Per-tap weight matrices for the real input channels: (KH*KW, Cout, Cin).
    w_taps = jnp.transpose(weight[:, 1:, :, :], (2, 3, 0, 1)).reshape(
        ksz_h * ksz_w, c_out, c_in)

    # Flatten spatial onto the lane axis (free row-major reshape) and zero-pad
    # so every tap's shifted window stays in bounds.  No layout transpose.
    x_flat = jnp.pad(x.reshape(n, c_in, hw), ((0, 0), (0, 0), (0, pad)))

    b_blk = _pick_batch_block(n)
    num_blocks = n // b_blk

    out_flat = pl.pallas_call(
        functools.partial(_concat_conv2d_kernel,
                          ksize_h=ksz_h, ksize_w=ksz_w, in_w=w),
        out_shape=jax.ShapeDtypeStruct((n, c_out, hw), x.dtype),
        grid_spec=pltpu.PrefetchScalarGridSpec(
            num_scalar_prefetch=0,
            grid=(num_blocks,),
            in_specs=[
                pl.BlockSpec((b_blk, c_in, sp), lambda i: (i, 0, 0)),
                pl.BlockSpec((ksz_h * ksz_w, c_out, c_in), lambda i: (0, 0, 0)),
                pl.BlockSpec((1, c_out, 1), lambda i: (0, 0, 0)),
            ],
            out_specs=pl.BlockSpec((b_blk, c_out, hw), lambda i: (i, 0, 0)),
        ),
        compiler_params=pltpu.CompilerParams(
            dimension_semantics=("parallel",)),
    )(x_flat, w_taps, eff_bias)

    # Valid outputs are the top-left Hout x Wout corner of each H x W plane.
    # The reshape is a free row-major view; the slice is tiny.  Channel order
    # is already NCHW, so no output transpose is needed.
    return out_flat.reshape(n, c_out, h, w)[:, :, :h_out, :w_out]


if __name__ == "__main__":
    key = jax.random.PRNGKey(0)
    kx, kw_key, kb_key = jax.random.split(key, 3)

    # Small shapes consistent with the module: dim_in=4, dim_out=8, 16x16 input.
    N, C_IN, H, W = 2, 4, 16, 16
    C_OUT, K = 8, KSIZE

    # Deterministic parameter init (PyTorch-default uniform(-1/sqrt(fan_in), ..)).
    fan_in = (C_IN + 1) * K * K
    bound = 1.0 / (fan_in ** 0.5)
    weight = jax.random.uniform(kw_key, (C_OUT, C_IN + 1, K, K),
                                jnp.float32, -bound, bound)
    bias = jax.random.uniform(kb_key, (C_OUT,), jnp.float32, -bound, bound)

    x = jax.random.normal(kx, (N, C_IN, H, W), jnp.float32)
    t = jnp.float32(0.5)

    out = jax.block_until_ready(concat_conv2d(t, x, weight, bias))
    assert out.shape == (N, C_OUT, H - K + 1, W - K + 1)

    # Reference: XLA conv on the actually-concatenated input (module semantics).
    tt_ref = jnp.ones_like(x[:, :1, :, :]) * t
    ttx_ref = jnp.concatenate([tt_ref, x], axis=1)
    ref = jax.lax.conv_general_dilated(
        ttx_ref, weight, window_strides=(1, 1), padding="VALID",
        dimension_numbers=("NCHW", "OIHW", "NCHW"),
        precision=jax.lax.Precision.HIGHEST,
    ) + bias.reshape(1, C_OUT, 1, 1)
    assert jnp.allclose(out, ref, atol=1e-4, rtol=1e-4)

    print("KERNEL_OK")
</pallas_src>

<mosaic_0001>
module attributes {stable_mosaic.version = 11 : i64} {
  func.func @_concat_conv2d_kernel(%arg0: i32, %arg1: memref<1x4x290xf32, #tpu.memory_space<vmem>>, %arg2: memref<9x8x4xf32, #tpu.memory_space<vmem>>, %arg3: memref<1x8x1xf32, #tpu.memory_space<vmem>>, %arg4: memref<1x8x256xf32, #tpu.memory_space<vmem>>) attributes {dimension_semantics = [#tpu.dimension_semantics<parallel>], iteration_bounds = array<i64: 2>, scalar_prefetch = 0 : i64, scratch_operands = 0 : i64, tpu.core_type = #tpu.core_type<tc>, window_params = [{transform_indices = @transform_0, window_bounds = array<i64: 1, 4, 290>}, {pipeline_mode = #tpu.pipeline_mode<synchronous>, transform_indices = @transform_1, window_bounds = array<i64: 9, 8, 4>}, {pipeline_mode = #tpu.pipeline_mode<synchronous>, transform_indices = @transform_2, window_bounds = array<i64: 1, 8, 1>}, {transform_indices = @transform_3, window_bounds = array<i64: 1, 8, 256>}]} {
    %c0 = arith.constant 0 : index
    %c0_0 = arith.constant 0 : index
    %c0_1 = arith.constant 0 : index
    %0 = vector.load %arg1[%c0, %c0_0, %c0_1] : memref<1x4x290xf32, #tpu.memory_space<vmem>>, vector<1x4x290xf32>
    %c0_2 = arith.constant 0 : index
    %c0_3 = arith.constant 0 : index
    %c0_4 = arith.constant 0 : index
    %1 = vector.load %arg2[%c0_2, %c0_3, %c0_4] : memref<9x8x4xf32, #tpu.memory_space<vmem>>, vector<9x8x4xf32>
    %c0_5 = arith.constant 0 : index
    %c0_6 = arith.constant 0 : index
    %c0_7 = arith.constant 0 : index
    %2 = vector.load %arg3[%c0_5, %c0_6, %c0_7] : memref<1x8x1xf32, #tpu.memory_space<vmem>>, vector<1x8x1xf32>
    %cst = arith.constant 0.000000e+00 : f32
    %3 = vector.broadcast %cst : f32 to vector<1x8x256xf32>
    %4 = vector.extract_strided_slice %0 {offsets = [0, 0, 0], sizes = [1, 4, 256], strides = [1, 1, 1]} : vector<1x4x290xf32> to vector<1x4x256xf32>
    %5 = vector.extract_strided_slice %1 {offsets = [0, 0, 0], sizes = [1, 8, 4], strides = [1, 1, 1]} : vector<9x8x4xf32> to vector<1x8x4xf32>
    %6 = vector.shape_cast %5 : vector<1x8x4xf32> to vector<8x4xf32>
    %7 = vector.shape_cast %6 : vector<8x4xf32> to vector<1x8x4xf32>
    "tpu.trace_start"() <{level = 10 : i32, message = "boc,bcj->boj"}> : () -> ()
    %cst_8 = arith.constant dense<0.000000e+00> : vector<1x8x256xf32>
    %8 = tpu.matmul %7, %4, %cst_8 {dimension_numbers = #tpu.dot_dimension_numbers<[2], [1], [1], [2], [0, 0, 0, 1, 1, 2], [0], [0]>} : vector<1x8x4xf32>, vector<1x4x256xf32>, vector<1x8x256xf32> -> vector<1x8x256xf32>
    "tpu.trace_stop"() : () -> ()
    %9 = arith.addf %3, %8 : vector<1x8x256xf32>
    %10 = vector.extract_strided_slice %0 {offsets = [0, 0, 1], sizes = [1, 4, 256], strides = [1, 1, 1]} : vector<1x4x290xf32> to vector<1x4x256xf32>
    %11 = vector.extract_strided_slice %1 {offsets = [1, 0, 0], sizes = [1, 8, 4], strides = [1, 1, 1]} : vector<9x8x4xf32> to vector<1x8x4xf32>
    %12 = vector.shape_cast %11 : vector<1x8x4xf32> to vector<8x4xf32>
    %13 = vector.shape_cast %12 : vector<8x4xf32> to vector<1x8x4xf32>
    "tpu.trace_start"() <{level = 10 : i32, message = "boc,bcj->boj"}> : () -> ()
    %cst_9 = arith.constant dense<0.000000e+00> : vector<1x8x256xf32>
    %14 = tpu.matmul %13, %10, %cst_9 {dimension_numbers = #tpu.dot_dimension_numbers<[2], [1], [1], [2], [0, 0, 0, 1, 1, 2], [0], [0]>} : vector<1x8x4xf32>, vector<1x4x256xf32>, vector<1x8x256xf32> -> vector<1x8x256xf32>
    "tpu.trace_stop"() : () -> ()
    %15 = arith.addf %9, %14 : vector<1x8x256xf32>
    %16 = vector.extract_strided_slice %0 {offsets = [0, 0, 2], sizes = [1, 4, 256], strides = [1, 1, 1]} : vector<1x4x290xf32> to vector<1x4x256xf32>
    %17 = vector.extract_strided_slice %1 {offsets = [2, 0, 0], sizes = [1, 8, 4], strides = [1, 1, 1]} : vector<9x8x4xf32> to vector<1x8x4xf32>
    %18 = vector.shape_cast %17 : vector<1x8x4xf32> to vector<8x4xf32>
    %19 = vector.shape_cast %18 : vector<8x4xf32> to vector<1x8x4xf32>
    "tpu.trace_start"() <{level = 10 : i32, message = "boc,bcj->boj"}> : () -> ()
    %cst_10 = arith.constant dense<0.000000e+00> : vector<1x8x256xf32>
    %20 = tpu.matmul %19, %16, %cst_10 {dimension_numbers = #tpu.dot_dimension_numbers<[2], [1], [1], [2], [0, 0, 0, 1, 1, 2], [0], [0]>} : vector<1x8x4xf32>, vector<1x4x256xf32>, vector<1x8x256xf32> -> vector<1x8x256xf32>
    "tpu.trace_stop"() : () -> ()
    %21 = arith.addf %15, %20 : vector<1x8x256xf32>
    %22 = vector.extract_strided_slice %0 {offsets = [0, 0, 16], sizes = [1, 4, 256], strides = [1, 1, 1]} : vector<1x4x290xf32> to vector<1x4x256xf32>
    %23 = vector.extract_strided_slice %1 {offsets = [3, 0, 0], sizes = [1, 8, 4], strides = [1, 1, 1]} : vector<9x8x4xf32> to vector<1x8x4xf32>
    %24 = vector.shape_cast %23 : vector<1x8x4xf32> to vector<8x4xf32>
    %25 = vector.shape_cast %24 : vector<8x4xf32> to vector<1x8x4xf32>
    "tpu.trace_start"() <{level = 10 : i32, message = "boc,bcj->boj"}> : () -> ()
    %cst_11 = arith.constant dense<0.000000e+00> : vector<1x8x256xf32>
    %26 = tpu.matmul %25, %22, %cst_11 {dimension_numbers = #tpu.dot_dimension_numbers<[2], [1], [1], [2], [0, 0, 0, 1, 1, 2], [0], [0]>} : vector<1x8x4xf32>, vector<1x4x256xf32>, vector<1x8x256xf32> -> vector<1x8x256xf32>
    "tpu.trace_stop"() : () -> ()
    %27 = arith.addf %21, %26 : vector<1x8x256xf32>
    %28 = vector.extract_strided_slice %0 {offsets = [0, 0, 17], sizes = [1, 4, 256], strides = [1, 1, 1]} : vector<1x4x290xf32> to vector<1x4x256xf32>
    %29 = vector.extract_strided_slice %1 {offsets = [4, 0, 0], sizes = [1, 8, 4], strides = [1, 1, 1]} : vector<9x8x4xf32> to vector<1x8x4xf32>
    %30 = vector.shape_cast %29 : vector<1x8x4xf32> to vector<8x4xf32>
    %31 = vector.shape_cast %30 : vector<8x4xf32> to vector<1x8x4xf32>
    "tpu.trace_start"() <{level = 10 : i32, message = "boc,bcj->boj"}> : () -> ()
    %cst_12 = arith.constant dense<0.000000e+00> : vector<1x8x256xf32>
    %32 = tpu.matmul %31, %28, %cst_12 {dimension_numbers = #tpu.dot_dimension_numbers<[2], [1], [1], [2], [0, 0, 0, 1, 1, 2], [0], [0]>} : vector<1x8x4xf32>, vector<1x4x256xf32>, vector<1x8x256xf32> -> vector<1x8x256xf32>
    "tpu.trace_stop"() : () -> ()
    %33 = arith.addf %27, %32 : vector<1x8x256xf32>
    %34 = vector.extract_strided_slice %0 {offsets = [0, 0, 18], sizes = [1, 4, 256], strides = [1, 1, 1]} : vector<1x4x290xf32> to vector<1x4x256xf32>
    %35 = vector.extract_strided_slice %1 {offsets = [5, 0, 0], sizes = [1, 8, 4], strides = [1, 1, 1]} : vector<9x8x4xf32> to vector<1x8x4xf32>
    %36 = vector.shape_cast %35 : vector<1x8x4xf32> to vector<8x4xf32>
    %37 = vector.shape_cast %36 : vector<8x4xf32> to vector<1x8x4xf32>
    "tpu.trace_start"() <{level = 10 : i32, message = "boc,bcj->boj"}> : () -> ()
    %cst_13 = arith.constant dense<0.000000e+00> : vector<1x8x256xf32>
    %38 = tpu.matmul %37, %34, %cst_13 {dimension_numbers = #tpu.dot_dimension_numbers<[2], [1], [1], [2], [0, 0, 0, 1, 1, 2], [0], [0]>} : vector<1x8x4xf32>, vector<1x4x256xf32>, vector<1x8x256xf32> -> vector<1x8x256xf32>
    "tpu.trace_stop"() : () -> ()
    %39 = arith.addf %33, %38 : vector<1x8x256xf32>
    %40 = vector.extract_strided_slice %0 {offsets = [0, 0, 32], sizes = [1, 4, 256], strides = [1, 1, 1]} : vector<1x4x290xf32> to vector<1x4x256xf32>
    %41 = vector.extract_strided_slice %1 {offsets = [6, 0, 0], sizes = [1, 8, 4], strides = [1, 1, 1]} : vector<9x8x4xf32> to vector<1x8x4xf32>
    %42 = vector.shape_cast %41 : vector<1x8x4xf32> to vector<8x4xf32>
    %43 = vector.shape_cast %42 : vector<8x4xf32> to vector<1x8x4xf32>
    "tpu.trace_start"() <{level = 10 : i32, message = "boc,bcj->boj"}> : () -> ()
    %cst_14 = arith.constant dense<0.000000e+00> : vector<1x8x256xf32>
    %44 = tpu.matmul %43, %40, %cst_14 {dimension_numbers = #tpu.dot_dimension_numbers<[2], [1], [1], [2], [0, 0, 0, 1, 1, 2], [0], [0]>} : vector<1x8x4xf32>, vector<1x4x256xf32>, vector<1x8x256xf32> -> vector<1x8x256xf32>
    "tpu.trace_stop"() : () -> ()
    %45 = arith.addf %39, %44 : vector<1x8x256xf32>
    %46 = vector.extract_strided_slice %0 {offsets = [0, 0, 33], sizes = [1, 4, 256], strides = [1, 1, 1]} : vector<1x4x290xf32> to vector<1x4x256xf32>
    %47 = vector.extract_strided_slice %1 {offsets = [7, 0, 0], sizes = [1, 8, 4], strides = [1, 1, 1]} : vector<9x8x4xf32> to vector<1x8x4xf32>
    %48 = vector.shape_cast %47 : vector<1x8x4xf32> to vector<8x4xf32>
    %49 = vector.shape_cast %48 : vector<8x4xf32> to vector<1x8x4xf32>
    "tpu.trace_start"() <{level = 10 : i32, message = "boc,bcj->boj"}> : () -> ()
    %cst_15 = arith.constant dense<0.000000e+00> : vector<1x8x256xf32>
    %50 = tpu.matmul %49, %46, %cst_15 {dimension_numbers = #tpu.dot_dimension_numbers<[2], [1], [1], [2], [0, 0, 0, 1, 1, 2], [0], [0]>} : vector<1x8x4xf32>, vector<1x4x256xf32>, vector<1x8x256xf32> -> vector<1x8x256xf32>
    "tpu.trace_stop"() : () -> ()
    %51 = arith.addf %45, %50 : vector<1x8x256xf32>
    %52 = vector.extract_strided_slice %0 {offsets = [0, 0, 34], sizes = [1, 4, 256], strides = [1, 1, 1]} : vector<1x4x290xf32> to vector<1x4x256xf32>
    %53 = vector.extract_strided_slice %1 {offsets = [8, 0, 0], sizes = [1, 8, 4], strides = [1, 1, 1]} : vector<9x8x4xf32> to vector<1x8x4xf32>
    %54 = vector.shape_cast %53 : vector<1x8x4xf32> to vector<8x4xf32>
    %55 = vector.shape_cast %54 : vector<8x4xf32> to vector<1x8x4xf32>
    "tpu.trace_start"() <{level = 10 : i32, message = "boc,bcj->boj"}> : () -> ()
    %cst_16 = arith.constant dense<0.000000e+00> : vector<1x8x256xf32>
    %56 = tpu.matmul %55, %52, %cst_16 {dimension_numbers = #tpu.dot_dimension_numbers<[2], [1], [1], [2], [0, 0, 0, 1, 1, 2], [0], [0]>} : vector<1x8x4xf32>, vector<1x4x256xf32>, vector<1x8x256xf32> -> vector<1x8x256xf32>
    "tpu.trace_stop"() : () -> ()
    %57 = arith.addf %51, %56 : vector<1x8x256xf32>
    %58 = vector.broadcast %2 : vector<1x8x1xf32> to vector<1x8x256xf32>
    %59 = arith.addf %57, %58 : vector<1x8x256xf32>
    %c0_17 = arith.constant 0 : index
    %c0_18 = arith.constant 0 : index
    %c0_19 = arith.constant 0 : index
    %60 = vector.load %arg4[%c0_17, %c0_18, %c0_19] : memref<1x8x256xf32, #tpu.memory_space<vmem>>, vector<1x8x256xf32>
    tpu.vector_store %arg4[%c0_17, %c0_18, %c0_19], %59 {strides = array<i32>} : memref<1x8x256xf32, #tpu.memory_space<vmem>>, vector<1x8x256xf32>,
    return
  }
  func.func @transform_0(%arg0: i32) -> (i32, i32, i32) {
    %c0_i32 = arith.constant 0 : i32
    %c0_i32_0 = arith.constant 0 : i32
    %c0_i32_1 = arith.constant 0 : i32
    return %arg0, %c0_i32, %c0_i32_0 : i32, i32, i32
  }
  func.func @transform_1(%arg0: i32) -> (i32, i32, i32) {
    %c0_i32 = arith.constant 0 : i32
    %c0_i32_0 = arith.constant 0 : i32
    %c0_i32_1 = arith.constant 0 : i32
    %c0_i32_2 = arith.constant 0 : i32
    return %c0_i32, %c0_i32_0, %c0_i32_1 : i32, i32, i32
  }
  func.func @transform_2(%arg0: i32) -> (i32, i32, i32) {
    %c0_i32 = arith.constant 0 : i32
    %c0_i32_0 = arith.constant 0 : i32
    %c0_i32_1 = arith.constant 0 : i32
    %c0_i32_2 = arith.constant 0 : i32
    return %c0_i32, %c0_i32_0, %c0_i32_1 : i32, i32, i32
  }
  func.func @transform_3(%arg0: i32) -> (i32, i32, i32) {
    %c0_i32 = arith.constant 0 : i32
    %c0_i32_0 = arith.constant 0 : i32
    %c0_i32_1 = arith.constant 0 : i32
    return %arg0, %c0_i32, %c0_i32_0 : i32, i32, i32
  }
}

</mosaic_0001>

<bundles_post_ra>
// kernel: tpu_custom_call.1
= control target key start
LH: loop header
LB: loop body
LE: loop exit
PB: predicated region body
PF: predicated region fallthrough
CT: control target
= control target key end

     0   :  { %8 = vsyncpa [#allocation3], 0  ;;  %s1191_s0 = inlined_call_operand.vmem [shape: f32[2,4,290], index: 0, kind: input, shape index: {}]   ;;  %s1192_s1 = inlined_call_operand.vmem [shape: f32[9,8,4], index: 1, kind: input, shape index: {}]   ;;  %s1193_s2 = inlined_call_operand.vmem [shape: f32[1,8,1], index: 2, kind: input, shape index: {}]   ;;  %s1194_s3 = inlined_call_operand.hbm [shape: f32[2,8,256], index: 3, kind: output, shape index: {}]  }
   0x1   :  { %10 = vsyncpa [#allocation3 + $0x1], 0  ;;  %s1021_s12 = smov 0   ;;  %s1023_s13 = smov 0  }
   0x2   :  { %s1025_s14 = smov 0   ;;  %s1027_s15 = smov 0  }
   0x3 LB: > { %s1042_s16 = sadd.s32 4294967295, %s990_s15   ;;  %s830_s17 = sadd.s32 4294967294, %s990_s15   ;;  %s990_s15 = sphi %s1027_s15, %s1200_s15   ;;  %s986_s14 = sphi %s1025_s14, %s1199_s14   ;;  %s982_s13 = sphi %s1023_s13, %s1198_s13   ;;  %s978_s12 = sphi %s1021_s12, %s1197_s12  }
   0x4   : > { %s1046_s18 = sadd.s32 1, %s990_s15   ;;  %s91_s19 = sadd.s32 1, %s986_s14 }
   0x5   : > { %s88_s20 = ssub.s32 %s990_s15, %s1046_s18  ;;  %p101_p0 = scmp.ne.s32.totalorder %s986_s14, %s982_s13 }
   0x6   : > { %p89_p1 = scmp.eq.s32.totalorder %s88_s20, 0  ;;  %p102_p2 = scmp.eq.s32.totalorder %s1042_s16, 1 }
   0x7   : > { %p107_p3 = scmp.ne.s32.totalorder %s982_s13, %s978_s12  ;;  %p108_p4 = scmp.eq.s32.totalorder %s830_s17, 1 }
   0x8   : > { %s1057_s21 = scalar_select %p89_p1, %s986_s14, %s91_s19  }
   0x9   : > { %p1059_p5 = por %p102_p2, %p101_p0  ;;  %p1063_p6 = por %p108_p4, %p107_p3 }
   0xa   : > { %p833_p7 = scmp.ge.s32.totalorder %s990_s15, 1  ;;  %p140_p8 = scmp.lt.s32.totalorder %s990_s15, 3 }
   0xc   : > { %p141_p9 = pnand %p833_p7, %p140_p8 }
   0xd   : > { %p164_p10 = scmp.lt.s32.totalorder (!%p141_p9), %s1042_s16, 1  ;;  %s992_s29 = smov (!%p141_p9), 127  }
   0xe   : > { %144 = sbr.rel (%p141_p9) target bundleno = 348 (0x15c), region = 32  ;;  %s993_s30 = smov (!%p141_p9), 126  }
   0xf   : > { %s994_s4 = smov (!%p141_p9), 112   ;;  %s995_s5 = smov (!%p141_p9), 111  }
  0x10   : > { %s996_s6 = smov (!%p141_p9), 110   ;;  %s997_s7 = smov (!%p141_p9), 96  }
  0x11   : > { %s998_s8 = smov (!%p141_p9), 95   ;;  %s999_s9 = smov (!%p141_p9), 94  }
  0x12   : > { %s161_s17 = sand.u32 (!%p141_p9), 1, %s982_s13   ;;  %s877_s20 = sshll.u32 (!%p141_p9), %s1042_s16, 4 }
  0x13   : > { %s165_s24 = scalar_select %p164_p10, %s1042_s16, 1  ;;  %vm202_vm0 = vcmask 1043456   ;;  %vm198_vm1 = vcmask 31744   ;;  %v171_v28 = vld [vmem:[%s1192_s1] sm:$0xff]  ;;  %vm309_vm2 = vcmask 1031168   ;;  %vm195_vm3 = vcmask 1039360  }
  0x14   : > { %v172_v35 = vld [vmem:[%s1192_s1 + $0x8] sm:$0xff]  ;;  %v173_v40 = vld [vmem:[%s1192_s1 + $0x10] sm:$0xff]  ;;  %vm373_vm4 = vcmask 916480   ;;  %v174_v45 = vld [vmem:[%s1192_s1 + $0x18] sm:$0xff]  ;;  %vm437_vm5 = vcmask 908288   ;;  %v1000_v55 = vmov 0   ;;  %s766_s26 = scalar_lea.hbm %s1194_s3, %s877_s20 }
  0x15   : > { %s878_s25 = smul.u32 12, %s165_s24  ;;  %v175_v51 = vld [vmem:[%s1192_s1 + $0x20] sm:$0xff]  ;;  %927 = vset.pattern.permute.xlu0 %v1000_v55  ;;  %vm501_vm6 = vcmask 900096   ;;  %v176_v58 = vld [vmem:[%s1192_s1 + $0x28] sm:$0xff]  ;;  %vm565_vm7 = vcmask 785408   ;;  %vm629_vm8 = vcmask 777216  }
  0x16   : > { %v180_v54 = vld [vmem:[%s1193_s2] sm:$0xff]  ;;  %vm693_vm9 = vcmask 769024   ;;  %s834_s19 = sshll.u32 %s161_s17, 4  ;;  %s755_s16 = scalar_lea.sflag [#allocation3], %s161_s17 }
  0x17   : > { %s168_s28 = scalar_lea.vmem %s1191_s0, %s878_s25  ;;  %s163_s27 = scalar_lea.vmem [#allocation2], %s834_s19 }
  0x18   : > { %v1074_v0 = vld [vmem:[%s168_s28] sm:$0xff]  ;;  %v170_v1 = vld [vmem:[%s168_s28 + $0x8] sm:$0xf]  ;;  %s768_s28 = sshll.u32 %s163_s27, 4  ;;  %s769_s28 = int_to_ptr.vmem [resolvable:$true] %s768_s28 }
  0x19   : > { %183 = vst [vmem:[#allocation1] ss:$2 sm:$0xff] %v1074_v0 }
  0x1a   : > { %185 = vst [vmem:[#allocation1 + $0x10] ss:$2 sm:$0xff] %v170_v1 }
  0x20   : > { %v186_v2 = vld.sshfl [vmem:[#allocation1] sm:$0xff pattern:$0x75316420]  ;;  %v187_v3 = vld.sshfl [vmem:[#allocation1 + $0x8] sm:$0xff pattern:$0x75316420] }
  0x21   : > { %189 = vrot.lane.b32.xlu0 %v186_v2, %s992_s29  ;;  %v188_v4 = vld.sshfl [vmem:[#allocation1 + $0x10] sm:$0xff pattern:$0x75316420]  ;;  %247 = vst [vmem:[#allocation1] ss:$2 sm:$0xff] %v1074_v0 }
  0x22   : > { %193 = vrot.lane.b32.xlu1 %v188_v4, %s992_s29  ;;  %299 = vst [vmem:[#allocation1 + $0x10] ss:$2 sm:$0xff] %v170_v1 }
  0x28   : > { %v1078_v5 = vld.sshfl [vmem:[#allocation1] sm:$0xff pattern:$0x75316420]  ;;  %v1080_v6 = vld.sshfl [vmem:[#allocation1 + $0x8] sm:$0xff pattern:$0x75316420] }
  0x29   : > { %191 = vrot.lane.b32.xlu0 %v187_v3, %s992_s29  ;;  %297 = vst [vmem:[#allocation1] ss:$2 sm:$0xff] %v1074_v0  ;;  %v302_v7 = vld.sshfl [vmem:[#allocation1 + $0x10] sm:$0xff pattern:$0x75316420]  ;;  %840 = vmatpush.msk.msra.mxu2 %vm202_vm0, %v1078_v5  ;;  %s770_s29 = sshll.u32 %s766_s26, 4  ;;  %s771_s29 = int_to_ptr.hbm [resolvable:$true] %s770_s29 }
  0x2a   : > { %307 = vrot.lane.b32.xlu2 %v302_v7, %s993_s30  ;;  %363 = vst [vmem:[#allocation1 + $0x10] ss:$2 sm:$0xff] %v170_v1  ;;  %842 = vmatpush.msk.msra.mxu3 %vm202_vm0, %v1080_v6  ;;  %v178_v6 = vld [vmem:[%s1192_s1 + $0x38] sm:$0xff] }
  0x2b   : > { %841 = vmatmul.msk.f32.vlgmr.msra.gmra.mxu2 %vm198_vm1, %v171_v28  ;;  %843 = vmatmul.msk.f32.vlgmr.msra.gmra.mxu3 %vm198_vm1, %v171_v28 }
  0x30   : > { %v300_v8 = vld.sshfl [vmem:[#allocation1] sm:$0xff pattern:$0x75316420]  ;;  %v301_v9 = vld.sshfl [vmem:[#allocation1 + $0x8] sm:$0xff pattern:$0x75316420] }
  0x31   : > { %303 = vrot.lane.b32.xlu1 %v300_v8, %s993_s30  ;;  %361 = vst [vmem:[#allocation1] ss:$2 sm:$0xff] %v1074_v0  ;;  %v366_v10 = vld.sshfl [vmem:[#allocation1 + $0x10] sm:$0xff pattern:$0x75316420] }
  0x32   : > { %305 = vrot.lane.b32.xlu2 %v301_v9, %s993_s30  ;;  %427 = vst [vmem:[#allocation1 + $0x10] ss:$2 sm:$0xff] %v170_v1  ;;  %s942_s30 = sshra.s32 %s771_s29, 4  ;;  %s943_s30 = int_to_ptr.hbm [resolvable:$true] %s942_s30 }
  0x33   : > { %p949_p0 = scmp.lt.s32.totalorder %s943_s30, %s1194_s3 }
  0x38   : > { %v365_v11 = vld.sshfl [vmem:[#allocation1 + $0x8] sm:$0xff pattern:$0x75316420]  ;;  %v364_v12 = vld.sshfl [vmem:[#allocation1] sm:$0xff pattern:$0x75316420] }
  0x39   : > { %369 = vrot.lane.b32.xlu1 %v365_v11, %s994_s4  ;;  %367 = vrot.lane.b32.xlu0 %v364_v12, %s994_s4  ;;  %425 = vst [vmem:[#allocation1] ss:$2 sm:$0xff] %v1074_v0  ;;  %v430_v13 = vld.sshfl [vmem:[#allocation1 + $0x10] sm:$0xff pattern:$0x75316420]  ;;  %v179_v12 = vld [vmem:[%s1192_s1 + $0x40] sm:$0xff] }
  0x3a   : > { %371 = vrot.lane.b32.xlu2 %v366_v10, %s994_s4  ;;  %491 = vst [vmem:[#allocation1 + $0x10] ss:$2 sm:$0xff] %v170_v1  ;;  %s944_s4 = scalar_lea.hbm %s943_s30, 16 }
  0x3b   : > { %p945_p11 = scmp.ne.s32.totalorder %s943_s30, %s944_s4 }
  0x3d   : > { %p946_p12 = pnand %p945_p11, %p1059_p5 }
  0x3f   : > { %p947_p13 = pneg %p946_p12 }
  0x40   : > { %v429_v14 = vld.sshfl [vmem:[#allocation1 + $0x8] sm:$0xff pattern:$0x75316420]  ;;  %v428_v15 = vld.sshfl [vmem:[#allocation1] sm:$0xff pattern:$0x75316420] }
  0x41   : > { %433 = vrot.lane.b32.xlu1 %v429_v14, %s995_s5  ;;  %431 = vrot.lane.b32.xlu0 %v428_v15, %s995_s5  ;;  %489 = vst [vmem:[#allocation1] ss:$2 sm:$0xff] %v1074_v0  ;;  %v494_v16 = vld.sshfl [vmem:[#allocation1 + $0x10] sm:$0xff pattern:$0x75316420] }
  0x42   : > { %435 = vrot.lane.b32.xlu2 %v430_v13, %s995_s5  ;;  %555 = vst [vmem:[#allocation1 + $0x10] ss:$2 sm:$0xff] %v170_v1 }
  0x48   : > { %v493_v17 = vld.sshfl [vmem:[#allocation1 + $0x8] sm:$0xff pattern:$0x75316420]  ;;  %v492_v18 = vld.sshfl [vmem:[#allocation1] sm:$0xff pattern:$0x75316420] }
  0x49   : > { %497 = vrot.lane.b32.xlu1 %v493_v17, %s996_s6  ;;  %495 = vrot.lane.b32.xlu0 %v492_v18, %s996_s6  ;;  %553 = vst [vmem:[#allocation1] ss:$2 sm:$0xff] %v1074_v0  ;;  %v558_v19 = vld.sshfl [vmem:[#allocation1 + $0x10] sm:$0xff pattern:$0x75316420] }
  0x4a   : > { %499 = vrot.lane.b32.xlu2 %v494_v16, %s996_s6  ;;  %619 = vst [vmem:[#allocation1 + $0x10] ss:$2 sm:$0xff] %v170_v1 }
  0x50   : > { %v557_v20 = vld.sshfl [vmem:[#allocation1 + $0x8] sm:$0xff pattern:$0x75316420]  ;;  %v556_v21 = vld.sshfl [vmem:[#allocation1] sm:$0xff pattern:$0x75316420] }
  0x51   : > { %561 = vrot.lane.b32.xlu1 %v557_v20, %s997_s7  ;;  %559 = vrot.lane.b32.xlu0 %v556_v21, %s997_s7  ;;  %617 = vst [vmem:[#allocation1] ss:$2 sm:$0xff] %v1074_v0  ;;  %v622_v22 = vld.sshfl [vmem:[#allocation1 + $0x10] sm:$0xff pattern:$0x75316420] }
  0x52   : > { %563 = vrot.lane.b32.xlu2 %v558_v19, %s997_s7  ;;  %683 = vst [vmem:[#allocation1 + $0x10] ss:$2 sm:$0xff] %v170_v1  ;;  %s948_s7 = scalar_lea.hbm %s1194_s3, 32 }
  0x53   : > { %p950_p1 = scmp.lt.s32.totalorder %s948_s7, %s944_s4 }
  0x55   : > { %p951_p2 = por %p950_p1, %p949_p0 }
  0x57   : > { %p952_p3 = pnand %p951_p2, %p947_p13 }
  0x58   : > { %v621_v23 = vld.sshfl [vmem:[#allocation1 + $0x8] sm:$0xff pattern:$0x75316420]  ;;  %v620_v24 = vld.sshfl [vmem:[#allocation1] sm:$0xff pattern:$0x75316420] }
  0x59   : > { %625 = vrot.lane.b32.xlu1 %v621_v23, %s998_s8  ;;  %623 = vrot.lane.b32.xlu0 %v620_v24, %s998_s8  ;;  %681 = vst [vmem:[#allocation1] ss:$2 sm:$0xff] %v1074_v0  ;;  %v686_v25 = vld.sshfl [vmem:[#allocation1 + $0x10] sm:$0xff pattern:$0x75316420] }
  0x5a   : > { %627 = vrot.lane.b32.xlu2 %v622_v22, %s998_s8  ;;  %v177_v0 = vld [vmem:[%s1192_s1 + $0x30] sm:$0xff] }
  0x60   : > { %v685_v26 = vld.sshfl [vmem:[#allocation1 + $0x8] sm:$0xff pattern:$0x75316420]  ;;  %v684_v27 = vld.sshfl [vmem:[#allocation1] sm:$0xff pattern:$0x75316420] }
  0x61   : > { %689 = vrot.lane.b32.xlu1 %v685_v26, %s999_s9  ;;  %687 = vrot.lane.b32.xlu0 %v684_v27, %s999_s9 }
  0x62   : > { %691 = vrot.lane.b32.xlu2 %v686_v25, %s999_s9 }
  0x69   : > { %747 = vperm.xlu0 %927, %v180_v54  }
  0x84   : > { %v308_v29 = vpop.permute.xlu2 %307 }
  0x8c   : > { %v306_v31 = vpop.permute.xlu2 %305 }
  0x8d   : > { %v311_v34 = vsel %vm309_vm2, %v306_v31, %v308_v29 }
  0x93   : > { %v190_v30 = vpop.permute.xlu0 %189 }
  0x94   : > { %v194_v32 = vpop.permute.xlu1 %193  ;;  %v372_v38 = vpop.permute.xlu2 %371 }
  0x9b   : > { %v192_v33 = vpop.permute.xlu0 %191 }
  0x9c   : > { %v196_v36 = vsel %vm195_vm3, %v190_v30, %v192_v33  ;;  %v197_v37 = vsel %vm195_vm3, %v192_v33, %v194_v32  ;;  %v436_v42 = vpop.permute.xlu2 %435 }
  0x9d   : > { %836 = vmatpush.msk.msra.mxu0 %vm202_vm0, %v196_v36  ;;  %838 = vmatpush.msk.msra.mxu1 %vm202_vm0, %v197_v37 }
  0x9e   : > { %837 = vmatmul.msk.f32.vlgmr.msra.gmra.mxu0 %vm198_vm1, %v172_v35  ;;  %839 = vmatmul.msk.f32.vlgmr.msra.gmra.mxu1 %vm198_vm1, %v172_v35 }
  0x9f   : > { %846 = vmatpush.msk.msrb.mxu1 %vm202_vm0, %v311_v34 }
  0xa3   : > { %v304_v39 = vpop.permute.xlu1 %303 }
  0xa4   : > { %v310_v41 = vsel %vm309_vm2, %v304_v39, %v306_v31  ;;  %v500_v48 = vpop.permute.xlu2 %499 }
  0xa5   : > { %844 = vmatpush.msk.msrb.mxu0 %vm202_vm0, %v310_v41 }
  0xa6   : > { %845 = vmatmul.msk.f32.vlgmr.msrb.gmra.mxu0 %vm198_vm1, %v173_v40  ;;  %847 = vmatmul.msk.f32.vlgmr.msrb.gmra.mxu1 %vm198_vm1, %v173_v40 }
  0xab   : > { %v370_v43 = vpop.permute.xlu1 %369  ;;  %v368_v44 = vpop.permute.xlu0 %367 }
  0xac   : > { %v374_v46 = vsel %vm373_vm4, %v368_v44, %v370_v43  ;;  %v375_v47 = vsel %vm373_vm4, %v370_v43, %v372_v38  ;;  %v564_v61 = vpop.permute.xlu2 %563 }
  0xad   : > { %848 = vmatpush.msk.msrb.mxu2 %vm202_vm0, %v374_v46  ;;  %850 = vmatpush.msk.msrb.mxu3 %vm202_vm0, %v375_v47 }
  0xae   : > { %849 = vmatmul.msk.f32.vlgmr.msrb.gmra.mxu2 %vm198_vm1, %v174_v45  ;;  %851 = vmatmul.msk.f32.vlgmr.msrb.gmra.mxu3 %vm198_vm1, %v174_v45  ;;  %v274_v17 = vpop.f32.mrf.mxu2  ;;  %v294_v18 = vpop.f32.mrf.mxu3 }
  0xb3   : > { %v434_v49 = vpop.permute.xlu1 %433  ;;  %v432_v50 = vpop.permute.xlu0 %431 }
  0xb4   : > { %v439_v52 = vsel %vm437_vm5, %v434_v49, %v436_v42  ;;  %v438_v53 = vsel %vm437_vm5, %v432_v50, %v434_v49  ;;  %v628_v3 = vpop.permute.xlu2 %627 }
  0xb5   : > { %852 = vmatpush.msk.msra.mxu0 %vm202_vm0, %v438_v53  ;;  %854 = vmatpush.msk.msra.mxu1 %vm202_vm0, %v439_v52 }
  0xb6   : > { %853 = vmatmul.msk.f32.vlgmr.msra.gmra.mxu0 %vm198_vm1, %v175_v51  ;;  %855 = vmatmul.msk.f32.vlgmr.msra.gmra.mxu1 %vm198_vm1, %v175_v51 }
  0xbb   : > { %v498_v56 = vpop.permute.xlu1 %497  ;;  %v496_v57 = vpop.permute.xlu0 %495 }
  0xbc   : > { %v503_v59 = vsel %vm501_vm6, %v498_v56, %v500_v48  ;;  %v502_v60 = vsel %vm501_vm6, %v496_v57, %v498_v56  ;;  %v692_v9 = vpop.permute.xlu2 %691 }
  0xbd   : > { %856 = vmatpush.msk.msra.mxu2 %vm202_vm0, %v502_v60  ;;  %858 = vmatpush.msk.msra.mxu3 %vm202_vm0, %v503_v59 }
  0xbe   : > { %857 = vmatmul.msk.f32.vlgmr.msra.gmra.mxu2 %vm198_vm1, %v176_v58  ;;  %859 = vmatmul.msk.f32.vlgmr.msra.gmra.mxu3 %vm198_vm1, %v176_v58 }
  0xc3   : > { %v562_v62 = vpop.permute.xlu1 %561  ;;  %v560_v63 = vpop.permute.xlu0 %559 }
  0xc4   : > { %v567_v1 = vsel %vm565_vm7, %v562_v62, %v564_v61  ;;  %v566_v2 = vsel %vm565_vm7, %v560_v63, %v562_v62 }
  0xc5   : > { %860 = vmatpush.msk.msrb.mxu0 %vm202_vm0, %v566_v2  ;;  %862 = vmatpush.msk.msrb.mxu1 %vm202_vm0, %v567_v1 }
  0xc6   : > { %861 = vmatmul.msk.f32.vlgmr.msrb.gmra.mxu0 %vm198_vm1, %v177_v0  ;;  %863 = vmatmul.msk.f32.vlgmr.msrb.gmra.mxu1 %vm198_vm1, %v177_v0 }
  0xcb   : > { %v626_v4 = vpop.permute.xlu1 %625  ;;  %v624_v5 = vpop.permute.xlu0 %623 }
  0xcc   : > { %v631_v7 = vsel %vm629_vm8, %v626_v4, %v628_v3  ;;  %v630_v8 = vsel %vm629_vm8, %v624_v5, %v626_v4 }
  0xcd   : > { %864 = vmatpush.msk.msrb.mxu2 %vm202_vm0, %v630_v8  ;;  %866 = vmatpush.msk.msrb.mxu3 %vm202_vm0, %v631_v7 }
  0xce   : > { %865 = vmatmul.msk.f32.vlgmr.msrb.gmra.mxu2 %vm198_vm1, %v178_v6  ;;  %867 = vmatmul.msk.f32.vlgmr.msrb.gmra.mxu3 %vm198_vm1, %v178_v6 }
  0xd3   : > { %v690_v10 = vpop.permute.xlu1 %689  ;;  %v688_v11 = vpop.permute.xlu0 %687 }
  0xd4   : > { %v695_v13 = vsel %vm693_vm9, %v690_v10, %v692_v9  ;;  %v694_v14 = vsel %vm693_vm9, %v688_v11, %v690_v10 }
  0xd5   : > { %868 = vmatpush.msk.msra.mxu0 %vm202_vm0, %v694_v14  ;;  %870 = vmatpush.msk.msra.mxu1 %vm202_vm0, %v695_v13 }
  0xd6   : > { %869 = vmatmul.msk.f32.vlgmr.msra.gmra.mxu0 %vm198_vm1, %v179_v12  ;;  %871 = vmatmul.msk.f32.vlgmr.msra.gmra.mxu1 %vm198_vm1, %v179_v12 }
  0xdb   : > { %v748_v45 = vpop.permute.xlu0 %747 }
 0x11b   : > { %v224_v15 = vpop.f32.mrf.mxu0  ;;  %v244_v16 = vpop.f32.mrf.mxu1 }
 0x11c   : > { %v275_v21 = vadd.f32 %v274_v17, %v224_v15  ;;  %v295_v22 = vadd.f32 %v294_v18, %v244_v16 }
 0x123   : > { %v336_v19 = vpop.f32.mrf.mxu0  ;;  %v356_v20 = vpop.f32.mrf.mxu1 }
 0x124   : > { %v359_v25 = vadd.f32 %v336_v19, %v275_v21  ;;  %v360_v26 = vadd.f32 %v356_v20, %v295_v22 }
 0x131   : > { %v400_v23 = vpop.f32.mrf.mxu2  ;;  %v420_v24 = vpop.f32.mrf.mxu3 }
 0x132   : > { %v423_v29 = vadd.f32 %v400_v23, %v359_v25  ;;  %v424_v30 = vadd.f32 %v420_v24, %v360_v26 }
 0x133   : > { %v464_v27 = vpop.f32.mrf.mxu0  ;;  %v484_v28 = vpop.f32.mrf.mxu1 }
 0x134   : > { %v487_v33 = vadd.f32 %v464_v27, %v423_v29  ;;  %v488_v34 = vadd.f32 %v484_v28, %v424_v30 }
 0x141   : > { %v528_v31 = vpop.f32.mrf.mxu2  ;;  %v548_v32 = vpop.f32.mrf.mxu3 }
 0x142   : > { %v551_v37 = vadd.f32 %v528_v31, %v487_v33  ;;  %v552_v38 = vadd.f32 %v548_v32, %v488_v34 }
 0x143   : > { %v592_v35 = vpop.f32.mrf.mxu0  ;;  %v612_v36 = vpop.f32.mrf.mxu1 }
 0x144   : > { %v615_v39 = vadd.f32 %v592_v35, %v551_v37  ;;  %v616_v40 = vadd.f32 %v612_v36, %v552_v38 }
 0x151   : > { %v656_v41 = vpop.f32.mrf.mxu2  ;;  %v676_v42 = vpop.f32.mrf.mxu3 }
 0x152   : > { %v679_v43 = vadd.f32 %v656_v41, %v615_v39  ;;  %v680_v44 = vadd.f32 %v676_v42, %v616_v40 }
 0x153   : > { %v720_v46 = vpop.f32.mrf.mxu0  ;;  %v740_v47 = vpop.f32.mrf.mxu1 }
 0x154   : > { %v743_v48 = vadd.f32 %v720_v46, %v679_v43  ;;  %v744_v49 = vadd.f32 %v740_v47, %v680_v44 }
 0x156   : > { %v750_v50 = vadd.f32 %v748_v45, %v743_v48  ;;  %v751_v51 = vadd.f32 %v748_v45, %v744_v49 }
 0x158   : > { %752 = vst [vmem:[%s163_s27] sm:$0xff] %v750_v50 }
 0x159   : > { %753 = vst [vmem:[%s163_s27 + $0x8] sm:$0xff] %v751_v51 }
 0x15a   : > { %955 = shalt.err (!%p952_p3)
}
 0x15b   : > { %879 = dma.vmem_to_hbm [thread:$0]  (%p1059_p5), %s769_s28, 256, %s771_s29, %s755_s16  }
 0x15c PF: > { %p885_p4 = scmp.ge.s32.totalorder %s990_s15, 2  ;;  %s782_s10 = sand.u32 1, %s978_s12  }
 0x15d   : > { %s783_s11 = scalar_lea.sflag [#allocation3], %s782_s10 }
 0x15e   : > { %p882_p7 = pnand %p885_p4, %p1063_p6 }
 0x160   : > { %p883_p8 = pneg %p882_p7 }
 0x162   : > { %973 = dma.done.wait (%p883_p8), %s783_s11, 256  }
 0x163   : > { %975 = vsyncadd (%p883_p8), %s783_s11, 4294967040  ;;  %p13_p9 = scmp.ge.s32.totalorder %s1046_s18, 4   ;;  %s1197_s12 = smov %s982_s13 }
 0x164   : > { %s1198_s13 = smov %s986_s14  ;;  %s1199_s14 = smov %s1057_s21 }
 0x165   : > { %s1200_s15 = smov %s1046_s18  ;;  %15 = sbr.rel (!%p13_p9) target bundleno = 3 (0x3), region = 75 }
 0x16a   :  { %789 = vsyncpa [#allocation3], 1 }
 0x16b   :  { %791 = vsyncpa [#allocation3 + $0x1], 1 }

</bundles_post_ra>
